<compile_context>
chip_gen: v5e
topology: v5e:2x2
jax: 0.10.0
libtpu: 0.0.40
codegen_flags: <defaults>
</compile_context>

<pallas_src>
import numpy as np
import jax
import jax.numpy as jnp
from jax.experimental import pallas as pl
from jax.experimental.pallas import tpu as pltpu


# ---------------------------------------------------------------------------
# Pallas kernel: depthwise conv1d with 'same' padding along the token axis.
# ---------------------------------------------------------------------------
def _dwconv1d_same_kernel(w_ref, x_ref, o_ref, xp_ref):
    """w_ref : (K,) f32 taps in SMEM (already padded + flipped)
       x_ref : (1, N, TD) input block in VMEM
       o_ref : (1, N, TD) output block in VMEM
       xp_ref: (N + K - 1, TD) f32 VMEM scratch (zero halos + x interior)
    """
    K = w_ref.shape[0]
    half = K // 2
    N = x_ref.shape[1]
    TD = x_ref.shape[2]

    x = x_ref[0].astype(jnp.float32)                       # (N, TD)

    # Build the zero-padded view inside VMEM — no HBM pad copy.  Halo rows are
    # rewritten every grid step so this stays correct under megacore sharding
    # (a core may never see grid index (0, 0)).  K-1 rows: negligible cost.
    if half > 0:
        zeros = jnp.zeros((half, TD), jnp.float32)
        xp_ref[0:half, :] = zeros
        xp_ref[half + N:, :] = zeros
    xp_ref[half:half + N, :] = x

    # Centre tap first: saves a full-block zero-materialise + add on the VPU.
    acc = x * w_ref[half]
    for k in range(K):                 # K is small and static -> unrolled taps
        if k == half:
            continue
        acc = acc + xp_ref[k:k + N, :] * w_ref[k]
    o_ref[0] = acc.astype(o_ref.dtype)


def depthwise_conv1d_same(x, w, *, tile_d=None):
    """x: (B, N, D) embeddings, w: (K,) f32 taps (K odd). Returns (B, N, D)."""
    B, N, D = x.shape
    K = int(w.shape[0])
    half = K // 2
    itemsize = np.dtype(x.dtype).itemsize

    # Lane tile: a multiple of 128 dividing D when possible (lane-dense,
    # unmasked stores); otherwise the full (small) D — a full-extent last dim
    # also satisfies the (8,128) BlockSpec rule.  ~4 MiB per input tile keeps
    # double-buffered in+out+scratch well under v7x's 64 MiB VMEM while still
    # amortising the ~0.35 us per-grid-step overhead on v5e/v6e.
    if tile_d is None:
        if D % 128 == 0:
            budget = 4 * 1024 * 1024
            tile_d = max(128, min(D, (budget // max(1, N * itemsize)) // 128 * 128))
            while D % tile_d != 0:
                tile_d -= 128
        else:
            tile_d = D  # small-D path (e.g. the toy test); lanes under-filled.
    assert D % tile_d == 0
    d_tiles = D // tile_d

    tile_bytes = N * tile_d * itemsize
    needed = 2 * 2 * tile_bytes + (N + 2 * half) * tile_d * 4  # in/out dbl-buf + scratch
    vmem_limit = int(min(max(2 * needed, 32 * 1024 * 1024), 48 * 1024 * 1024))

    cost = pl.CostEstimate(
        flops=2 * K * B * N * D,
        transcendentals=0,
        bytes_accessed=2 * B * N * D * itemsize + K * 4,
    )

    # TODO(synk): very long N combined with a small non-128-multiple D would
    # additionally need token-axis tiling with overlapping halo blocks; not
    # required at this module's sequence lengths.
    return pl.pallas_call(
        _dwconv1d_same_kernel,
        out_shape=jax.ShapeDtypeStruct((B, N, D), x.dtype),
        grid=(B, d_tiles),
        in_specs=[
            pl.BlockSpec(memory_space=pltpu.MemorySpace.SMEM),        # taps
            pl.BlockSpec((1, N, tile_d), lambda b, d: (b, 0, d)),
        ],
        out_specs=pl.BlockSpec((1, N, tile_d), lambda b, d: (b, 0, d)),
        scratch_shapes=[pltpu.VMEM((N + 2 * half, tile_d), jnp.float32)],
        compiler_params=pltpu.CompilerParams(
            dimension_semantics=("parallel", "parallel"),
            vmem_limit_bytes=vmem_limit),
        cost_estimate=cost,
    )(w.astype(jnp.float32), x)


# ---------------------------------------------------------------------------
# Module-equivalent (setup + forward glue around the Pallas conv).
# ---------------------------------------------------------------------------
class AdversarialBlockShift:
    def __init__(self, attacks, embedding_weight, extra_tokens=(5, 5)):
        self.embedding_weight = embedding_weight            # (V, D)
        self.extra_tokens = list(extra_tokens)
        (self.mask_name, self.frontend_user_mask,
         self.max_left_shift, self.max_right_shift) = \
            self._get_move_mask_and_shifts(attacks, self.extra_tokens)

        # Deterministic parameter init: one-hot shift kernel.  Index
        # `max_left_shift` would be the identity; we place the 1.0 two slots
        # to the left so the forward pass performs a real left-shift by 2.
        P = self.max_left_shift + self.max_right_shift + 1
        param = np.zeros((1, P), np.float32)
        param[0, self.max_left_shift - 2] = 1.0
        self.param = jnp.asarray(param)

        self.left_pad = int(max(0, self.max_right_shift - self.max_left_shift))
        self.right_pad = int(max(0, self.max_left_shift - self.max_right_shift))
        self.padded_kernel_size = 2 * max(self.max_left_shift,
                                          self.max_right_shift) + 1

    @staticmethod
    def _find_attack_key(attacks):
        names = [k for k in attacks if k in ('prefix_mask', 'suffix_mask')]
        if len(names) == 0:
            raise ValueError('requires attack=suffix or attack=prefix')
        if len(names) > 1:
            raise ValueError('prefix and suffix simultaneously not supported')
        return names[0]

    def _get_move_mask_and_shifts(self, attacks, extra_tokens):
        mask_name = self._find_attack_key(attacks)
        response_mask = np.asarray(attacks['response_mask'])
        response_begin = int(np.nonzero(response_mask)[-1][0])
        frontend_user_mask = ~response_mask
        frontend_user_mask[..., :extra_tokens[0]] = False
        frontend_user_mask[..., response_begin - extra_tokens[1]:] = False
        block_mask = np.asarray(attacks[mask_name])
        move_mask = np.concatenate(
            [b[f] for b, f in zip(block_mask, frontend_user_mask)], axis=0)
        nz = np.nonzero(move_mask)[-1]
        max_left_shift = int(nz[0])
        max_right_shift = int(len(move_mask) - (nz[-1] + 1))
        return mask_name, frontend_user_mask, max_left_shift, max_right_shift

    def _embed(self, input_ids):
        return jnp.take(self.embedding_weight, jnp.asarray(input_ids), axis=0)

    def forward(self, inputs):
        inputs = dict(inputs)
        batch_embeds = inputs.pop('inputs_embeds', None)
        if batch_embeds is None:
            batch_embeds = self._embed(inputs['input_ids'])
        attack_masks = np.asarray(inputs[self.mask_name]).astype(bool)
        input_ids = np.asarray(inputs['input_ids'])
        B = batch_embeds.shape[0]

        # F.pad(param, (left_pad, right_pad)).flip(-1).  Taps kept in f32
        # end-to-end (a bf16 cast would quantise learned taps).
        padded_kernel = jnp.pad(
            self.param.astype(jnp.float32),
            ((0, 0), (self.left_pad, self.right_pad)))[0, ::-1]       # (K,)
        K = self.padded_kernel_size
        # mask_shift from the dominant tap (argmax) instead of the brittle
        # `== 1.0` float-equality of the PyTorch original; identical for the
        # one-hot init, robust after training / dtype casts.
        tap_idx = (K - 1) - (self.left_pad +
                             int(np.argmax(np.abs(np.asarray(self.param)[0]))))
        mask_shift = K // 2 - tap_idx

        # Boolean-mask gathers (masks are concrete -> static index lists).
        fe_idx = [np.nonzero(m)[0] for m in self.frontend_user_mask]
        other_idx = [np.nonzero(~m)[0] for m in self.frontend_user_mask]
        if len({len(i) for i in fe_idx}) != 1:
            # TODO(synk): ragged per-batch frontend lengths would need
            # per-batch kernel calls (or a padded/masked batch).
            raise NotImplementedError(
                'ragged per-batch frontend-user lengths are not supported')
        fe_idx = jnp.asarray(np.stack(fe_idx))            # (B, Nfe)
        other_idx = jnp.asarray(np.stack(other_idx))      # (B, No)

        # One batched gather each (replaces B tiny per-batch gathers/concats).
        fe_embeds = jnp.take_along_axis(batch_embeds, fe_idx[..., None], axis=1)
        other_embeds = jnp.take_along_axis(batch_embeds, other_idx[..., None],
                                           axis=1)

        # ---- hot path: depthwise conv1d 'same' in Pallas ----
        new_fe_embeds = depthwise_conv1d_same(fe_embeds, padded_kernel)

        # Single batched concat (same per-batch layout as the PyTorch loop,
        # including the original's `other[extra_tokens[1]:]` tail slice).
        inputs_embeds = jnp.concatenate(
            [other_embeds[:, :self.extra_tokens[0]],
             new_fe_embeds,
             other_embeds[:, self.extra_tokens[1]:]], axis=1)

        # no-grad input_ids reshuffle (pure host-side index glue)
        output_ids = []
        for b in range(B):
            am = attack_masks[b]
            current_start = int(np.nonzero(am)[0][0])
            new_start = current_start + mask_shift
            nonadv = input_ids[b][~am]
            adv = input_ids[b][am]
            output_ids.append(
                np.concatenate([nonadv[:new_start], adv, nonadv[new_start:]]))

        inputs['inputs_embeds'] = inputs_embeds
        inputs['input_ids'] = jnp.asarray(np.stack(output_ids))
        return inputs


# ---------------------------------------------------------------------------
if __name__ == "__main__":
    B, S, D, V = 2, 24, 32, 64
    extra_tokens = [3, 3]

    # Synthetic attack config: response starts at token 16, adversarial
    # suffix block occupies tokens 8..11 (inside the frontend-user region).
    response_mask = np.zeros((B, S), dtype=bool)
    response_mask[:, 16:] = True
    suffix_mask = np.zeros((B, S), dtype=bool)
    suffix_mask[:, 8:12] = True
    attacks = {'suffix_mask': suffix_mask, 'response_mask': response_mask}

    key = jax.random.PRNGKey(0)
    k_emb, k_ids, k_big = jax.random.split(key, 3)
    embedding_weight = jax.random.normal(k_emb, (V, D), dtype=jnp.float32)
    input_ids = jax.random.randint(k_ids, (B, S), 0, V, dtype=jnp.int32)

    module = AdversarialBlockShift(attacks, embedding_weight, extra_tokens)
    inputs = {'input_ids': input_ids, 'suffix_mask': suffix_mask}
    out = module.forward(inputs)
    jax.block_until_ready(out['inputs_embeds'])
    jax.block_until_ready(out['input_ids'])
    assert out['inputs_embeds'].shape == (B, S, D)
    assert out['input_ids'].shape == (B, S)

    # Check 1: module-path Pallas conv vs a pure-jnp reference (small D).
    fe_idx = np.nonzero(module.frontend_user_mask[0])[0]
    emb = jnp.take(embedding_weight, input_ids, axis=0)
    fe = jnp.take_along_axis(
        emb, jnp.asarray(np.stack([fe_idx] * B))[..., None], axis=1)
    pk = jnp.pad(module.param.astype(jnp.float32),
                 ((0, 0), (module.left_pad, module.right_pad)))[0, ::-1]
    Kk = int(pk.shape[0])
    half = Kk // 2
    xp = jnp.pad(fe, ((0, 0), (half, half), (0, 0)))
    ref = sum(pk[k] * xp[:, k:k + fe.shape[1], :] for k in range(Kk))
    got = depthwise_conv1d_same(fe, pk)
    assert jnp.allclose(got, ref, atol=1e-5), "pallas conv mismatch (module path)"

    # Check 2: lane-dense multi-tile path (D multiple of 128, 2 D-tiles).
    xb = jax.random.normal(k_big, (2, 16, 256), dtype=jnp.float32)
    wb = jnp.asarray(np.array([0.1, 0.0, 0.5, 0.25, 0.15], np.float32))
    hb = int(wb.shape[0]) // 2
    xpb = jnp.pad(xb, ((0, 0), (hb, hb), (0, 0)))
    refb = sum(wb[k] * xpb[:, k:k + xb.shape[1], :] for k in range(int(wb.shape[0])))
    gotb = depthwise_conv1d_same(xb, wb, tile_d=128)
    assert jnp.allclose(gotb, refb, atol=1e-5), "pallas conv mismatch (tiled path)"

    print("KERNEL_OK")
</pallas_src>

<mosaic_0001>
module attributes {stable_mosaic.version = 11 : i64} {
  func.func @_dwconv1d_same_kernel(%arg0: i32, %arg1: i32, %arg2: memref<11xf32, #tpu.memory_space<smem>>, %arg3: memref<1x10x32xf32, #tpu.memory_space<vmem>>, %arg4: memref<1x10x32xf32, #tpu.memory_space<vmem>>, %arg5: memref<20x32xf32, #tpu.memory_space<vmem>>) attributes {dimension_semantics = [#tpu.dimension_semantics<parallel>, #tpu.dimension_semantics<parallel>], iteration_bounds = array<i64: 2, 1>, scalar_prefetch = 0 : i64, scratch_operands = 1 : i64, tpu.core_type = #tpu.core_type<tc>, window_params = [{transform_indices = @transform_0, window_bounds = array<i64: 11>}, {transform_indices = @transform_1, window_bounds = array<i64: 1, 10, 32>}, {transform_indices = @transform_2, window_bounds = array<i64: 1, 10, 32>}]} {
    %c0 = arith.constant 0 : index
    %c0_0 = arith.constant 0 : index
    %c0_1 = arith.constant 0 : index
    %0 = vector.load %arg3[%c0, %c0_0, %c0_1] : memref<1x10x32xf32, #tpu.memory_space<vmem>>, vector<1x10x32xf32>
    %1 = vector.shape_cast %0 : vector<1x10x32xf32> to vector<10x32xf32>
    %cst = arith.constant 0.000000e+00 : f32
    %2 = vector.broadcast %cst : f32 to vector<5x32xf32>
    %c0_2 = arith.constant 0 : index
    %c0_3 = arith.constant 0 : index
    %3 = vector.load %arg5[%c0_2, %c0_3] : memref<20x32xf32, #tpu.memory_space<vmem>>, vector<5x32xf32>
    tpu.vector_store %arg5[%c0_2, %c0_3], %2 {strides = array<i32>} : memref<20x32xf32, #tpu.memory_space<vmem>>, vector<5x32xf32>,
    %c15 = arith.constant 15 : index
    %c0_4 = arith.constant 0 : index
    %4 = vector.load %arg5[%c15, %c0_4] : memref<20x32xf32, #tpu.memory_space<vmem>>, vector<5x32xf32>
    tpu.vector_store %arg5[%c15, %c0_4], %2 {strides = array<i32>} : memref<20x32xf32, #tpu.memory_space<vmem>>, vector<5x32xf32>,
    %c5 = arith.constant 5 : index
    %c0_5 = arith.constant 0 : index
    %5 = vector.load %arg5[%c5, %c0_5] : memref<20x32xf32, #tpu.memory_space<vmem>>, vector<10x32xf32>
    tpu.vector_store %arg5[%c5, %c0_5], %1 {strides = array<i32>} : memref<20x32xf32, #tpu.memory_space<vmem>>, vector<10x32xf32>,
    %c5_6 = arith.constant 5 : index
    %6 = memref.load %arg2[%c5_6] : memref<11xf32, #tpu.memory_space<smem>>
    %7 = vector.broadcast %6 : f32 to vector<10x32xf32>
    %8 = arith.mulf %1, %7 : vector<10x32xf32>
    %c0_7 = arith.constant 0 : index
    %c0_8 = arith.constant 0 : index
    %9 = vector.load %arg5[%c0_7, %c0_8] : memref<20x32xf32, #tpu.memory_space<vmem>>, vector<10x32xf32>
    %c0_9 = arith.constant 0 : index
    %10 = memref.load %arg2[%c0_9] : memref<11xf32, #tpu.memory_space<smem>>
    %11 = vector.broadcast %10 : f32 to vector<10x32xf32>
    %12 = arith.mulf %9, %11 : vector<10x32xf32>
    %13 = arith.addf %8, %12 : vector<10x32xf32>
    %c1 = arith.constant 1 : index
    %c0_10 = arith.constant 0 : index
    %14 = vector.load %arg5[%c1, %c0_10] : memref<20x32xf32, #tpu.memory_space<vmem>>, vector<10x32xf32>
    %c1_11 = arith.constant 1 : index
    %15 = memref.load %arg2[%c1_11] : memref<11xf32, #tpu.memory_space<smem>>
    %16 = vector.broadcast %15 : f32 to vector<10x32xf32>
    %17 = arith.mulf %14, %16 : vector<10x32xf32>
    %18 = arith.addf %13, %17 : vector<10x32xf32>
    %c2 = arith.constant 2 : index
    %c0_12 = arith.constant 0 : index
    %19 = vector.load %arg5[%c2, %c0_12] : memref<20x32xf32, #tpu.memory_space<vmem>>, vector<10x32xf32>
    %c2_13 = arith.constant 2 : index
    %20 = memref.load %arg2[%c2_13] : memref<11xf32, #tpu.memory_space<smem>>
    %21 = vector.broadcast %20 : f32 to vector<10x32xf32>
    %22 = arith.mulf %19, %21 : vector<10x32xf32>
    %23 = arith.addf %18, %22 : vector<10x32xf32>
    %c3 = arith.constant 3 : index
    %c0_14 = arith.constant 0 : index
    %24 = vector.load %arg5[%c3, %c0_14] : memref<20x32xf32, #tpu.memory_space<vmem>>, vector<10x32xf32>
    %c3_15 = arith.constant 3 : index
    %25 = memref.load %arg2[%c3_15] : memref<11xf32, #tpu.memory_space<smem>>
    %26 = vector.broadcast %25 : f32 to vector<10x32xf32>
    %27 = arith.mulf %24, %26 : vector<10x32xf32>
    %28 = arith.addf %23, %27 : vector<10x32xf32>
    %c4 = arith.constant 4 : index
    %c0_16 = arith.constant 0 : index
    %29 = vector.load %arg5[%c4, %c0_16] : memref<20x32xf32, #tpu.memory_space<vmem>>, vector<10x32xf32>
    %c4_17 = arith.constant 4 : index
    %30 = memref.load %arg2[%c4_17] : memref<11xf32, #tpu.memory_space<smem>>
    %31 = vector.broadcast %30 : f32 to vector<10x32xf32>
    %32 = arith.mulf %29, %31 : vector<10x32xf32>
    %33 = arith.addf %28, %32 : vector<10x32xf32>
    %c6 = arith.constant 6 : index
    %c0_18 = arith.constant 0 : index
    %34 = vector.load %arg5[%c6, %c0_18] : memref<20x32xf32, #tpu.memory_space<vmem>>, vector<10x32xf32>
    %c6_19 = arith.constant 6 : index
    %35 = memref.load %arg2[%c6_19] : memref<11xf32, #tpu.memory_space<smem>>
    %36 = vector.broadcast %35 : f32 to vector<10x32xf32>
    %37 = arith.mulf %34, %36 : vector<10x32xf32>
    %38 = arith.addf %33, %37 : vector<10x32xf32>
    %c7 = arith.constant 7 : index
    %c0_20 = arith.constant 0 : index
    %39 = vector.load %arg5[%c7, %c0_20] : memref<20x32xf32, #tpu.memory_space<vmem>>, vector<10x32xf32>
    %c7_21 = arith.constant 7 : index
    %40 = memref.load %arg2[%c7_21] : memref<11xf32, #tpu.memory_space<smem>>
    %41 = vector.broadcast %40 : f32 to vector<10x32xf32>
    %42 = arith.mulf %39, %41 : vector<10x32xf32>
    %43 = arith.addf %38, %42 : vector<10x32xf32>
    %c8 = arith.constant 8 : index
    %c0_22 = arith.constant 0 : index
    %44 = vector.load %arg5[%c8, %c0_22] : memref<20x32xf32, #tpu.memory_space<vmem>>, vector<10x32xf32>
    %c8_23 = arith.constant 8 : index
    %45 = memref.load %arg2[%c8_23] : memref<11xf32, #tpu.memory_space<smem>>
    %46 = vector.broadcast %45 : f32 to vector<10x32xf32>
    %47 = arith.mulf %44, %46 : vector<10x32xf32>
    %48 = arith.addf %43, %47 : vector<10x32xf32>
    %c9 = arith.constant 9 : index
    %c0_24 = arith.constant 0 : index
    %49 = vector.load %arg5[%c9, %c0_24] : memref<20x32xf32, #tpu.memory_space<vmem>>, vector<10x32xf32>
    %c9_25 = arith.constant 9 : index
    %50 = memref.load %arg2[%c9_25] : memref<11xf32, #tpu.memory_space<smem>>
    %51 = vector.broadcast %50 : f32 to vector<10x32xf32>
    %52 = arith.mulf %49, %51 : vector<10x32xf32>
    %53 = arith.addf %48, %52 : vector<10x32xf32>
    %c10 = arith.constant 10 : index
    %c0_26 = arith.constant 0 : index
    %54 = vector.load %arg5[%c10, %c0_26] : memref<20x32xf32, #tpu.memory_space<vmem>>, vector<10x32xf32>
    %c10_27 = arith.constant 10 : index
    %55 = memref.load %arg2[%c10_27] : memref<11xf32, #tpu.memory_space<smem>>
    %56 = vector.broadcast %55 : f32 to vector<10x32xf32>
    %57 = arith.mulf %54, %56 : vector<10x32xf32>
    %58 = arith.addf %53, %57 : vector<10x32xf32>
    %c0_28 = arith.constant 0 : index
    %c0_29 = arith.constant 0 : index
    %c0_30 = arith.constant 0 : index
    %59 = vector.load %arg4[%c0_28, %c0_29, %c0_30] : memref<1x10x32xf32, #tpu.memory_space<vmem>>, vector<1x10x32xf32>
    %60 = vector.shape_cast %59 : vector<1x10x32xf32> to vector<10x32xf32>
    %61 = vector.shape_cast %58 : vector<10x32xf32> to vector<1x10x32xf32>
    tpu.vector_store %arg4[%c0_28, %c0_29, %c0_30], %61 {strides = array<i32>} : memref<1x10x32xf32, #tpu.memory_space<vmem>>, vector<1x10x32xf32>,
    return
  }
  func.func @transform_0(%arg0: i32, %arg1: i32) -> i32 {
    %c0_i32 = arith.constant 0 : i32
    %c0_i32_0 = arith.constant 0 : i32
    return %c0_i32 : i32
  }
  func.func @transform_1(%arg0: i32, %arg1: i32) -> (i32, i32, i32) {
    %c0_i32 = arith.constant 0 : i32
    %c0_i32_0 = arith.constant 0 : i32
    return %arg0, %c0_i32, %arg1 : i32, i32, i32
  }
  func.func @transform_2(%arg0: i32, %arg1: i32) -> (i32, i32, i32) {
    %c0_i32 = arith.constant 0 : i32
    %c0_i32_0 = arith.constant 0 : i32
    return %arg0, %c0_i32, %arg1 : i32, i32, i32
  }
}

</mosaic_0001>

<bundles_post_ra>
// kernel: tpu_custom_call.1
= control target key start
LH: loop header
LB: loop body
LE: loop exit
PB: predicated region body
PF: predicated region fallthrough
CT: control target
= control target key end

     0   :  { %7 = vsyncpa [#allocation4], 0  ;;  %s501_s9 = smov 0   ;;  %s503_s10 = smov 0   ;;  %s573_s0 = inlined_call_operand.vmem [shape: f32[11], index: 0, kind: input, shape index: {}]   ;;  %s574_s1 = inlined_call_operand.vmem [shape: f32[2,10,32], index: 1, kind: input, shape index: {}]   ;;  %s575_s2 = inlined_call_operand.vmem [shape: f32[2,10,32], index: 2, kind: output, shape index: {}]  }
   0x1   :  { %s505_s11 = smov 0  }
   0x2 LB: > { %s380_s12 = sadd.s32 4294967295, %s482_s11   ;;  %s25_s13 = sadd.s32 1, %s478_s10  ;;  %s482_s11 = sphi %s505_s11, %s13_s11   ;;  %s478_s10 = sphi %s503_s10, %s577_s10   ;;  %s474_s9 = sphi %s501_s9, %s576_s9  }
   0x3   : > { %p27_p0 = scmp.ge.s32.totalorder %s25_s13, 2  ;;  %p382_p1 = scmp.ge.s32.totalorder %s482_s11, 1 }
   0x4   : > { %p107_p2 = scmp.lt.s32.totalorder %s482_s11, 3  ;;  %p413_p4 = scmp.eq.s32.totalorder %s380_s12, 0 }
   0x5   : > { %s579_s13 = smov (%p27_p0, %s25_s13), 0  ;;  %s119_s16 = sshll.u32 %s573_s0, 4  ;;  %s120_s16 = int_to_ptr.vmem [resolvable:$true] %s119_s16 }
   0x6   : > { %p108_p3 = pnand %p382_p1, %p107_p2  ;;  %s484_s17 = smov [#allocation3]  }
   0x8   : > { %p409_p5 = pneg %p108_p3  ;;  %143 = sbr.rel (%p108_p3) target bundleno = 54 (0x36), region = 28 }
   0xa   : > { %p410_p6 = pnand %p413_p4, %p409_p5 }
   0xc   : > { %412 = dma.vmem_to_smem (!%p410_p6), %s120_s16, 16, %s484_s17, [#allocation4]  }
   0xd   : > { %469 = dma.done.wait (%p413_p4), [#allocation4], 16  }
   0xe   : > { %471 = vsyncadd (%p413_p4), [#allocation4], 4294967280 }
   0xf   : > { %150 = sfence }
  0x10   : > { %vm191_vm0 = vcmask 258048   ;;  %p173_p7 = scmp.lt.s32.totalorder %s474_s9, 1  ;;  %v485_v0 = vmov 0.0   ;;  %s391_s18 = sld [smem:[#allocation3 + $0x5]]  ;;  %vm194_vm1 = vcmask 261120   ;;  %vm196_vm2 = vcmask 254976  }
  0x11   : > { %192 = vst.msk [vmem:[#allocation2] sm:$0x1f] %vm191_vm0, %v485_v0  ;;  %s204_s20 = sld [smem:[#allocation3]] }
  0x12   : > { %193 = vst.msk [vmem:[#allocation2 + $0xf] sm:$0x1f] %vm191_vm0, %v485_v0  ;;  %s581_s9 = smov (!%p173_p7, %s474_s9), 1  ;;  %s392_s24 = sld [smem:[#allocation3 + $0x1]] }
  0x13   : > { %s403_s19 = sshll.u32 %s581_s9, 4  ;;  %s532_s25 = sld [smem:[#allocation3 + $0x2]] }
  0x14   : > { %s180_s23 = scalar_lea.vmem %s574_s1, %s403_s19  ;;  %s535_s26 = sld [smem:[#allocation3 + $0x3]] }
  0x15   : > { %v189_v1 = vld [vmem:[%s180_s23] sm:$0xff]  ;;  %v190_v2 = vld [vmem:[%s180_s23 + $0x8] sm:$0x3]  ;;  %s537_s27 = sld [smem:[#allocation3 + $0x4]]  ;;  %s188_s7 = scalar_lea.vmem %s575_s2, %s403_s19 }
  0x16   : > { %195 = vst.msk [vmem:[#allocation2 + $0x5] sm:$0xff] %vm194_vm1, %v189_v1  ;;  %v199_v3 = vstv %s391_s18  ;;  %s539_s28 = sld [smem:[#allocation3 + $0x6]] }
  0x17   : > { %197 = vst.msk [vmem:[#allocation2 + $0xd] sm:$0x3] %vm196_vm2, %v190_v2  ;;  %v205_v4 = vstv %s204_s20  ;;  %v200_v5 = vmul.f32 %v199_v3, %v189_v1  ;;  %v201_v9 = vmul.f32 %v199_v3, %v190_v2  ;;  %s542_s29 = sld [smem:[#allocation3 + $0x7]] }
  0x18   : > { %v213_v8 = vstv %s392_s24  ;;  %s545_s30 = sld [smem:[#allocation3 + $0x8]] }
  0x19   : > { %v221_v13 = vstv %s532_s25  ;;  %s548_s3 = sld [smem:[#allocation3 + $0x9]]  ;;  %v251_v46 = vld [vmem:[#allocation2 + $0xf] sm:$0x3]  ;;  %v267_v60 = vld [vmem:[#allocation2 + $0x11] sm:$0x3] }
  0x1a   : > { %v229_v20 = vstv %s535_s26  ;;  %s551_s4 = sld [smem:[#allocation3 + $0xa]]  ;;  %v259_v53 = vld [vmem:[#allocation2 + $0x10] sm:$0x3]  ;;  %v275_v3 = vld [vmem:[#allocation2 + $0x12] sm:$0x3] }
  0x1b   : > { %v237_v27 = vstv %s537_s27 }
  0x1c   : > { %v245_v36 = vstv %s539_s28 }
  0x1d   : > { %v202_v6 = vld [vmem:[#allocation2] sm:$0xff]  ;;  %v203_v11 = vld [vmem:[#allocation2 + $0x8] sm:$0x3]  ;;  %v219_v18 = vld [vmem:[#allocation2 + $0xa] sm:$0x3]  ;;  %v253_v43 = vstv %s542_s29 }
  0x1e   : > { %v210_v7 = vld [vmem:[#allocation2 + $0x1] sm:$0xff]  ;;  %v206_v10 = vmul.f32 %v205_v4, %v202_v6  ;;  %v207_v14 = vmul.f32 %v205_v4, %v203_v11  ;;  %v211_v15 = vld [vmem:[#allocation2 + $0x9] sm:$0x3]  ;;  %v227_v25 = vld [vmem:[#allocation2 + $0xb] sm:$0x3]  ;;  %v223_v29 = vmul.f32 %v221_v13, %v219_v18  ;;  %v261_v49 = vstv %s545_s30 }
  0x1f   : > { %v218_v12 = vld [vmem:[#allocation2 + $0x2] sm:$0xff]  ;;  %v214_v17 = vmul.f32 %v213_v8, %v210_v7  ;;  %v215_v22 = vmul.f32 %v213_v8, %v211_v15  ;;  %v235_v32 = vld [vmem:[#allocation2 + $0xc] sm:$0x3]  ;;  %v231_v34 = vmul.f32 %v229_v20, %v227_v25  ;;  %v243_v39 = vld [vmem:[#allocation2 + $0xe] sm:$0x3]  ;;  %v269_v55 = vstv %s548_s3 }
  0x20   : > { %v208_v16 = vadd.f32 %v206_v10, %v200_v5  ;;  %v226_v19 = vld [vmem:[#allocation2 + $0x3] sm:$0xff]  ;;  %v209_v21 = vadd.f32 %v207_v14, %v201_v9  ;;  %v222_v24 = vmul.f32 %v221_v13, %v218_v12  ;;  %v239_v41 = vmul.f32 %v237_v27, %v235_v32 }
  0x21   : > { %v234_v26 = vld [vmem:[#allocation2 + $0x4] sm:$0xff]  ;;  %v230_v31 = vmul.f32 %v229_v20, %v226_v19  ;;  %v247_v50 = vmul.f32 %v245_v36, %v243_v39  ;;  %v255_v57 = vmul.f32 %v253_v43, %v251_v46  ;;  %v277_v62 = vstv %s551_s4 }
  0x22   : > { %v216_v23 = vadd.f32 %v214_v17, %v208_v16  ;;  %v217_v28 = vadd.f32 %v215_v22, %v209_v21  ;;  %v242_v35 = vld [vmem:[#allocation2 + $0x6] sm:$0xff]  ;;  %v238_v38 = vmul.f32 %v237_v27, %v234_v26  ;;  %v263_v0 = vmul.f32 %v261_v49, %v259_v53 }
  0x23   : > { %v250_v42 = vld [vmem:[#allocation2 + $0x7] sm:$0xff]  ;;  %v246_v45 = vmul.f32 %v245_v36, %v242_v35  ;;  %v271_v5 = vmul.f32 %v269_v55, %v267_v60  ;;  %v279_v9 = vmul.f32 %v277_v62, %v275_v3 }
  0x24   : > { %v224_v30 = vadd.f32 %v222_v24, %v216_v23  ;;  %v225_v33 = vadd.f32 %v223_v29, %v217_v28  ;;  %v258_v48 = vld [vmem:[#allocation2 + $0x8] sm:$0xff]  ;;  %v254_v52 = vmul.f32 %v253_v43, %v250_v42 }
  0x25   : > { %v266_v54 = vld [vmem:[#allocation2 + $0x9] sm:$0xff]  ;;  %v262_v59 = vmul.f32 %v261_v49, %v258_v48 }
  0x26   : > { %v232_v37 = vadd.f32 %v230_v31, %v224_v30  ;;  %v233_v40 = vadd.f32 %v231_v34, %v225_v33  ;;  %v274_v61 = vld [vmem:[#allocation2 + $0xa] sm:$0xff]  ;;  %v270_v2 = vmul.f32 %v269_v55, %v266_v54 }
  0x27   : > { %v278_v7 = vmul.f32 %v277_v62, %v274_v61 }
  0x28   : > { %v240_v44 = vadd.f32 %v238_v38, %v232_v37  ;;  %v241_v47 = vadd.f32 %v239_v41, %v233_v40 }
  0x2a   : > { %v248_v51 = vadd.f32 %v246_v45, %v240_v44  ;;  %v249_v56 = vadd.f32 %v247_v50, %v241_v47 }
  0x2c   : > { %v256_v58 = vadd.f32 %v254_v52, %v248_v51  ;;  %v257_v63 = vadd.f32 %v255_v57, %v249_v56 }
  0x2e   : > { %v264_v1 = vadd.f32 %v262_v59, %v256_v58  ;;  %v265_v4 = vadd.f32 %v263_v0, %v257_v63 }
  0x30   : > { %v272_v6 = vadd.f32 %v270_v2, %v264_v1  ;;  %v273_v8 = vadd.f32 %v271_v5, %v265_v4 }
  0x32   : > { %v280_v10 = vadd.f32 %v278_v7, %v272_v6  ;;  %v281_v11 = vadd.f32 %v279_v9, %v273_v8 }
  0x34   : > { %282 = vst.msk [vmem:[%s188_s7] sm:$0xff] %vm194_vm1, %v280_v10 }
  0x35   : > { %283 = vst.msk [vmem:[%s188_s7 + $0x8] sm:$0x3] %vm196_vm2, %v281_v11 }
  0x36 PF: > { %s13_s11 = sadd.s32 1, %s482_s11   ;;  %s576_s9 = smov %s478_s10 }
  0x37   : > { %p10_p8 = scmp.ge.s32.totalorder %s13_s11, 4   ;;  %s577_s10 = smov %s579_s13 }
  0x39   :  { %12 = sbr.rel (!%p10_p8) target bundleno = 2 (0x2), region = 63 }
  0x3e   :  { %311 = vsyncpa [#allocation4], 1 }
  0x3f   :  { %313 = vsyncpa [#allocation4 + $0x1], 1 }

</bundles_post_ra>
